<compile_context>
chip_gen: v7x
topology: tpu7x:2x2x1
jax: 0.10.0
libtpu: 0.0.40
codegen_flags: <defaults>
</compile_context>

<pallas_src>
from functools import partial

import jax
import jax.numpy as jnp
from jax import lax
from jax.experimental import pallas as pl
from jax.experimental.pallas import tpu as pltpu


def _mask_kernel(u_ref, band_h_ref, band_w_ref, keep_ref, *, gamma):
    """Per-batch keep mask.  Refs: u (H,W), band_h (H,H), band_w (W,W), keep (H,W)."""
    seed = (u_ref[...] < gamma).astype(jnp.float32)                    # (H, W) 0/1
    # window count = band_h @ seed @ band_w  (tiny MXU matmuls, mask pass only)
    cnt = jnp.dot(band_h_ref[...], seed, preferred_element_type=jnp.float32)
    cnt = jnp.dot(cnt, band_w_ref[...], preferred_element_type=jnp.float32)
    # max-pool of a 0/1 mask == (count > 0);  keep = 1 - pooled
    keep_ref[...] = 1.0 - (cnt > 0.5).astype(jnp.float32)


def _apply_kernel(scale_ref, mask_ref, x_ref, o_ref):
    """Elementwise apply.  scale (1,1) SMEM, mask (1,HW), x/o (C_TILE, HW)."""
    m = mask_ref[...] * scale_ref[0, 0]          # (1, HW): tiny vs the x tile
    o_ref[...] = (x_ref[...] * m).astype(o_ref.dtype)


def _pick_c_tile(C, HW, itemsize, budget_bytes=2 * 1024 * 1024):
    """Largest channel tile whose x block stays under ~budget_bytes (VMEM-safe
    on v5e/v6e/v7x with double-buffered input+output)."""
    per_row = max(1, HW * itemsize)
    max_rows = max(1, budget_bytes // per_row)
    if C <= max_rows:
        return C                    # full-C block: always a legal block dim
    return max(8, (max_rows // 8) * 8)   # otherwise a multiple of 8


def dropblock2d(x, key, *, block_size=3, drop_prob=0.1, training=True):
    """x: (B, C, H, W) float, NCHW (PyTorch convention)."""
    if (not training) or drop_prob == 0:
        return x
    assert block_size % 2 == 1, "stride-1 same-size max_pool2d needs odd block_size"

    B, C, H, W = x.shape
    pad = block_size // 2
    gamma = float(drop_prob) / float(block_size ** 2)
    HW = H * W

    # Noise draw kept outside the kernel so results are verifiable against the
    # jax.random / PyTorch-style reference (single tiny B*H*W stream).
    # TODO(synk): optionally generate in-kernel with pltpu.prng_random_bits
    # (would change the RNG stream vs the reference).
    u = jax.random.uniform(key, (B, H, W), dtype=jnp.float32)

    # Small per-axis banded 0/1 window-membership matrices.
    ih = jnp.arange(H)
    band_h = (jnp.abs(ih[:, None] - ih[None, :]) <= pad).astype(jnp.float32)
    iw = jnp.arange(W)
    band_w = (jnp.abs(iw[:, None] - iw[None, :]) <= pad).astype(jnp.float32)

    # ---- pass 1: per-batch keep mask (negligible work) ---------------------
    keep = pl.pallas_call(
        partial(_mask_kernel, gamma=gamma),
        out_shape=jax.ShapeDtypeStruct((B, H, W), jnp.float32),
        grid=(B,),
        in_specs=[
            pl.BlockSpec((None, H, W), lambda b: (b, 0, 0)),
            pl.BlockSpec((H, H), lambda b: (0, 0)),
            pl.BlockSpec((W, W), lambda b: (0, 0)),
        ],
        out_specs=pl.BlockSpec((None, H, W), lambda b: (b, 0, 0)),
        compiler_params=pltpu.CompilerParams(
            dimension_semantics=("parallel",)),
    )(u, band_h, band_w)

    # Global scale = numel / sum (scalar reduction over the tiny 0/1 mask).
    total = jnp.sum(keep)
    scale = (jnp.float32(B * H * W) / total).reshape(1, 1)

    # ---- pass 2: apply (heavy, streaming, lane-dense) -----------------------
    # NCHW indexed directly; (H, W) folded to an H*W last dim.  Both reshapes
    # are contiguous -> no transposes, no extra HBM traffic.
    x2 = x.reshape(B, C, HW)
    mask3 = keep.reshape(B, 1, HW)

    c_tile = _pick_c_tile(C, HW, x.dtype.itemsize)
    n_c = pl.cdiv(C, c_tile)

    out2 = pl.pallas_call(
        _apply_kernel,
        out_shape=jax.ShapeDtypeStruct((B, C, HW), x.dtype),
        grid=(B, n_c),
        in_specs=[
            pl.BlockSpec(memory_space=pltpu.MemorySpace.SMEM),          # scale
            pl.BlockSpec((None, 1, HW), lambda b, c: (b, 0, 0)),        # mask
            pl.BlockSpec((None, c_tile, HW), lambda b, c: (b, c, 0)),   # x
        ],
        out_specs=pl.BlockSpec((None, c_tile, HW), lambda b, c: (b, c, 0)),
        compiler_params=pltpu.CompilerParams(
            dimension_semantics=("parallel", "parallel"),
            vmem_limit_bytes=32 * 1024 * 1024),
    )(scale, mask3, x2)

    return out2.reshape(B, C, H, W)


def _dropblock_ref(x, u, *, block_size, drop_prob):
    """Pure-JAX reference mirroring the PyTorch forward (same uniform noise u)."""
    B, C, H, W = x.shape
    pad = block_size // 2
    gamma = drop_prob / block_size ** 2
    seed = (u.reshape(B, 1, H, W) < gamma).astype(jnp.float32)
    pooled = lax.reduce_window(
        seed, -jnp.inf, lax.max,
        window_dimensions=(1, 1, block_size, block_size),
        window_strides=(1, 1, 1, 1),
        padding=((0, 0), (0, 0), (pad, pad), (pad, pad)),
    )
    mask = 1.0 - pooled
    return x * mask * (mask.size / jnp.sum(mask))


if __name__ == "__main__":
    B, C, H, W = 2, 4, 16, 16
    key = jax.random.PRNGKey(0)
    kx, ku = jax.random.split(key)

    x = jax.random.normal(kx, (B, C, H, W), dtype=jnp.float32)

    out = dropblock2d(x, ku, block_size=3, drop_prob=0.1, training=True)
    out = jax.block_until_ready(out)

    # Verify against the pure-JAX reference using the same noise draw.
    u = jax.random.uniform(ku, (B, H, W), dtype=jnp.float32)
    ref = _dropblock_ref(x, u, block_size=3, drop_prob=0.1)
    assert out.shape == x.shape and out.dtype == x.dtype
    assert jnp.allclose(out, ref, rtol=1e-5, atol=1e-5), "mismatch vs reference"

    print("KERNEL_OK")
</pallas_src>

<mosaic_0001>
module attributes {stable_mosaic.version = 11 : i64} {
  func.func @_mask_kernel(%arg0: i32, %arg1: memref<1x16x16xf32, #tpu.memory_space<vmem>>, %arg2: memref<16x16xf32, #tpu.memory_space<vmem>>, %arg3: memref<16x16xf32, #tpu.memory_space<vmem>>, %arg4: memref<1x16x16xf32, #tpu.memory_space<vmem>>) attributes {dimension_semantics = [#tpu.dimension_semantics<parallel>], iteration_bounds = array<i64: 2>, scalar_prefetch = 0 : i64, scratch_operands = 0 : i64, tpu.core_type = #tpu.core_type<tc>, window_params = [{transform_indices = @transform_0, window_bounds = array<i64: 1, 16, 16>}, {pipeline_mode = #tpu.pipeline_mode<synchronous>, transform_indices = @transform_1, window_bounds = array<i64: 16, 16>}, {pipeline_mode = #tpu.pipeline_mode<synchronous>, transform_indices = @transform_2, window_bounds = array<i64: 16, 16>}, {transform_indices = @transform_3, window_bounds = array<i64: 1, 16, 16>}]} {
    %c0 = arith.constant 0 : index
    %c0_0 = arith.constant 0 : index
    %c0_1 = arith.constant 0 : index
    %0 = vector.load %arg1[%c0, %c0_0, %c0_1] : memref<1x16x16xf32, #tpu.memory_space<vmem>>, vector<1x16x16xf32>
    %1 = vector.shape_cast %0 : vector<1x16x16xf32> to vector<16x16xf32>
    %cst = arith.constant 0.0111111114 : f32
    %2 = vector.broadcast %cst : f32 to vector<16x16xf32>
    %3 = arith.cmpf olt, %1, %2 : vector<16x16xf32>
    %4 = arith.extui %3 : vector<16x16xi1> to vector<16x16xi32>
    %5 = arith.sitofp %4 : vector<16x16xi32> to vector<16x16xf32>
    %c0_2 = arith.constant 0 : index
    %c0_3 = arith.constant 0 : index
    %6 = vector.load %arg2[%c0_2, %c0_3] : memref<16x16xf32, #tpu.memory_space<vmem>>, vector<16x16xf32>
    %cst_4 = arith.constant dense<0.000000e+00> : vector<16x16xf32>
    %7 = tpu.matmul %6, %5, %cst_4 {dimension_numbers = #tpu.dot_dimension_numbers<[1], [0], [0], [1], [0, 0, 1, 1], [], []>} : vector<16x16xf32>, vector<16x16xf32>, vector<16x16xf32> -> vector<16x16xf32>
    %c0_5 = arith.constant 0 : index
    %c0_6 = arith.constant 0 : index
    %8 = vector.load %arg3[%c0_5, %c0_6] : memref<16x16xf32, #tpu.memory_space<vmem>>, vector<16x16xf32>
    %cst_7 = arith.constant dense<0.000000e+00> : vector<16x16xf32>
    %9 = tpu.matmul %7, %8, %cst_7 {dimension_numbers = #tpu.dot_dimension_numbers<[1], [0], [0], [1], [0, 0, 1, 1], [], []>} : vector<16x16xf32>, vector<16x16xf32>, vector<16x16xf32> -> vector<16x16xf32>
    %cst_8 = arith.constant 5.000000e-01 : f32
    %10 = vector.broadcast %cst_8 : f32 to vector<16x16xf32>
    %11 = arith.cmpf ogt, %9, %10 : vector<16x16xf32>
    %12 = arith.extui %11 : vector<16x16xi1> to vector<16x16xi32>
    %13 = arith.sitofp %12 : vector<16x16xi32> to vector<16x16xf32>
    %cst_9 = arith.constant 1.000000e+00 : f32
    %14 = vector.broadcast %cst_9 : f32 to vector<16x16xf32>
    %15 = arith.subf %14, %13 : vector<16x16xf32>
    %c0_10 = arith.constant 0 : index
    %c0_11 = arith.constant 0 : index
    %c0_12 = arith.constant 0 : index
    %16 = vector.load %arg4[%c0_10, %c0_11, %c0_12] : memref<1x16x16xf32, #tpu.memory_space<vmem>>, vector<1x16x16xf32>
    %17 = vector.shape_cast %16 : vector<1x16x16xf32> to vector<16x16xf32>
    %18 = vector.shape_cast %15 : vector<16x16xf32> to vector<1x16x16xf32>
    tpu.vector_store %arg4[%c0_10, %c0_11, %c0_12], %18 {strides = array<i32>} : memref<1x16x16xf32, #tpu.memory_space<vmem>>, vector<1x16x16xf32>,
    return
  }
  func.func @transform_0(%arg0: i32) -> (i32, i32, i32) {
    %c0_i32 = arith.constant 0 : i32
    %c0_i32_0 = arith.constant 0 : i32
    %c0_i32_1 = arith.constant 0 : i32
    return %arg0, %c0_i32, %c0_i32_0 : i32, i32, i32
  }
  func.func @transform_1(%arg0: i32) -> (i32, i32) {
    %c0_i32 = arith.constant 0 : i32
    %c0_i32_0 = arith.constant 0 : i32
    %c0_i32_1 = arith.constant 0 : i32
    return %c0_i32, %c0_i32_0 : i32, i32
  }
  func.func @transform_2(%arg0: i32) -> (i32, i32) {
    %c0_i32 = arith.constant 0 : i32
    %c0_i32_0 = arith.constant 0 : i32
    %c0_i32_1 = arith.constant 0 : i32
    return %c0_i32, %c0_i32_0 : i32, i32
  }
  func.func @transform_3(%arg0: i32) -> (i32, i32, i32) {
    %c0_i32 = arith.constant 0 : i32
    %c0_i32_0 = arith.constant 0 : i32
    %c0_i32_1 = arith.constant 0 : i32
    return %arg0, %c0_i32, %c0_i32_0 : i32, i32, i32
  }
}

</mosaic_0001>

<bundles_post_ra>
// kernel: tpu_custom_call.1
= control target key start
LH: loop header
LB: loop body
LE: loop exit
PB: predicated region body
PF: predicated region fallthrough
CT: control target
= control target key end

     0   :  { %8 = vsyncpa [#allocation3], 0  ;;  %s1083_s0 = inlined_call_operand.hbm [shape: f32[2,16,16], index: 0, kind: input, shape index: {}]   ;;  %s1084_s1 = inlined_call_operand.hbm [shape: f32[16,16], index: 1, kind: input, shape index: {}]   ;;  %s1085_s2 = inlined_call_operand.hbm [shape: f32[16,16], index: 2, kind: input, shape index: {}]   ;;  %s1086_s3 = inlined_call_operand.hbm [shape: f32[2,16,16], index: 3, kind: output, shape index: {}]  }
   0x1   :  { %10 = vsyncpa [#allocation3 + $0x1], 0 }
   0x2   :  { %11 = vsyncpa [#allocation6], 0 }
   0x3   :  { %12 = vsyncpa [#allocation4], 0 }
   0x4   :  { %14 = vsyncpa [#allocation4 + $0x1], 0  ;;  %s830_s12 = smov 0   ;;  %s832_s13 = smov 0  }
   0x5   :  { %s834_s14 = smov 0   ;;  %s836_s15 = smov 0  }
   0x6 LB: > { %s851_s16 = sadd.s32 4294967295, %s798_s15   ;;  %s509_s17 = sadd.s32 4294967294, %s798_s15   ;;  %s798_s15 = sphi %s836_s15, %s1106_s15   ;;  %s794_s14 = sphi %s834_s14, %s1105_s14   ;;  %s790_s13 = sphi %s832_s13, %s1104_s13   ;;  %s786_s12 = sphi %s830_s12, %s1103_s12  }
   0x7   : > { %p40_p0 = scmp.ne.s32.totalorder %s790_s13, %s786_s12  ;;  %p1087_p1 = scmp.eq.s32.totalorder %s851_s16, 0 }
   0x8   : > { %p112_p3 = scmp.eq.s32.totalorder %s509_s17, 1  ;;  %p510_p5 = scmp.ge.s32.totalorder %s798_s15, 1 }
   0x9   : > { %p860_p4 = por %p1087_p1, %p40_p0  ;;  %p119_p7 = scmp.lt.s32.totalorder %s798_s15, 3 }
   0xa   : > { %p865_p6 = por %p112_p3, %p40_p0  ;;  %s800_s21 = smov [#allocation5]  }
   0xb   : > { %s1090_s18 = scalar_select %p860_p4, 1, 0 }
   0xc   : > { %s1091_s19 = scalar_select %p865_p6, 1, 0 }
   0xd   : > { %p870_p8 = pnand %p510_p5, %p119_p7  ;;  %s131_s22 = sshll.u32 %s800_s21, 4  ;;  %s874_s22 = int_to_ptr.vmem [resolvable:$true] %s131_s22 }
   0xe   : > { %s801_s24 = smov [#allocation7]   ;;  %s642_s28 = scalar_lea.hbm %s1084_s1, 256 }
   0xf   : > { %p581_p9 = pneg %p870_p8  ;;  %s144_s25 = sshll.u32 %s801_s24, 4  ;;  %s885_s25 = int_to_ptr.vmem [resolvable:$true] %s144_s25 }
  0x10   : > { %p643_p12 = scmp.ne.s32.totalorder %s1084_s1, %s642_s28  ;;  %p649_p5 = scmp.lt.u32.totalorder %s642_s28, %s1084_s1 }
  0x11   : > { %p881_p11 = pnand %p581_p9, %p1087_p1 }
  0x13   : > { %p644_p13 = pneg %p881_p11 }
  0x15   : > { %p645_p0 = pnand %p644_p13, %p643_p12 }
  0x17   : > { %p646_p3 = pneg %p645_p0 }
  0x19   : > { %p651_p7 = pnand %p649_p5, %p646_p3 }
  0x1b   : > { %654 = shalt.err (!%p651_p7)
}
  0x1c   : > { %s655_s6 = scalar_lea.vmem %s874_s22, 256  ;;  %p663_p2 = scmp.lt.s32.totalorder %s874_s22, %s874_s22 }
  0x1d   : > { %p656_p9 = scmp.ne.s32.totalorder %s874_s22, %s655_s6  ;;  %p664_p12 = scmp.lt.s32.totalorder %s655_s6, %s655_s6 }
  0x1f   : > { %p658_p10 = pnand %p656_p9, %p644_p13  ;;  %p665_p0 = por %p664_p12, %p663_p2 }
  0x21   : > { %p659_p1 = pneg %p658_p10 }
  0x23   : > { %p666_p6 = pnand %p665_p0, %p659_p1 }
  0x25   : > { %669 = shalt.err (!%p666_p6)
}
  0x26   : > { %s802_s7 = smov 128   ;;  %s803_s8 = smov 8  }
  0x27   : > { %584 = dma.hbm_to_vmem [thread:$0]  (!%p881_p11), %s1084_s1, 256, %s874_s22, [#allocation6], %s802_s7, %s802_s7, %s803_s8  }
  0x28   : > { %s670_s21 = scalar_lea.hbm %s1085_s2, 256 }
  0x29   : > { %p671_p1 = scmp.ne.s32.totalorder %s1085_s2, %s670_s21  ;;  %p677_p10 = scmp.lt.u32.totalorder %s670_s21, %s1085_s2 }
  0x2b   : > { %p673_p2 = pnand %p671_p1, %p644_p13 }
  0x2d   : > { %p674_p6 = pneg %p673_p2 }
  0x2f   : > { %p679_p3 = pnand %p677_p10, %p674_p6 }
  0x31   : > { %682 = shalt.err (!%p679_p3)
}
  0x32   : > { %s683_s22 = scalar_lea.vmem %s885_s25, 256  ;;  %p691_p12 = scmp.lt.s32.totalorder %s885_s25, %s885_s25 }
  0x33   : > { %p684_p5 = scmp.ne.s32.totalorder %s885_s25, %s683_s22  ;;  %p692_p0 = scmp.lt.s32.totalorder %s683_s22, %s683_s22 }
  0x35   : > { %p686_p7 = pnand %p684_p5, %p644_p13  ;;  %p693_p1 = por %p692_p0, %p691_p12 }
  0x37   : > { %p687_p9 = pneg %p686_p7 }
  0x39   : > { %p694_p2 = pnand %p693_p1, %p687_p9 }
  0x3b   : > { %697 = shalt.err (!%p694_p2)
}
  0x3c   : > { %587 = dma.hbm_to_vmem [thread:$0]  (!%p881_p11), %s1085_s2, 256, %s885_s25, [#allocation6], %s802_s7, %s802_s7, %s803_s8  }
  0x3d   : > { %s946_s23 = sadd.s32 1, %s798_s15   ;;  %s27_s4 = sadd.s32 1, %s794_s14 }
  0x3e   : > { %s24_s5 = ssub.s32 %s798_s15, %s946_s23  ;;  %p34_p13 = scmp.ne.s32.totalorder %s794_s14, %s790_s13 }
  0x3f   : > { %p25_p6 = scmp.eq.s32.totalorder %s24_s5, 0  ;;  %p35_p10 = scmp.eq.s32.totalorder %s798_s15, 0 }
  0x40   : > { %p1094_p3 = scmp.eq.s32.totalorder %s851_s16, 1  ;;  %p598_p7 = scmp.lt.s32.totalorder %s798_s15, 2 }
  0x41   : > { %s962_s9 = scalar_select %p25_p6, %s794_s14, %s27_s4  }
  0x42   : > { %p956_p5 = por %p1094_p3, %p34_p13  ;;  %p36_p9 = por %p35_p10, %p34_p13 }
  0x43   : > { %s158_s10 = sand.u32 1, %s794_s14   ;;  %s537_s25 = sshll.u32 %s798_s15, 8 }
  0x44   : > { %s1095_s6 = scalar_select %p956_p5, 1, 0 }
  0x45   : > { %s514_s11 = sshll.u32 %s158_s10, 4  ;;  %s969_s24 = scalar_lea.hbm %s1083_s0, %s537_s25 }
  0x46   : > { %s162_s26 = scalar_lea.vmem [#allocation2], %s514_s11  ;;  %p973_p11 = pnand %p598_p7, %p36_p9 }
  0x47   : > { %s169_s27 = sshll.u32 %s162_s26, 4  ;;  %s977_s22 = scalar_lea.sflag [#allocation3], %s158_s10  ;;  %s971_s27 = int_to_ptr.vmem [resolvable:$true] %s169_s27 }
  0x48   : > { %s698_s29 = scalar_lea.hbm %s969_s24, 256  ;;  %p700_p0 = pneg %p973_p11 }
  0x49   : > { %p699_p12 = scmp.ne.s32.totalorder %s969_s24, %s698_s29  ;;  %s703_s5 = scalar_lea.hbm %s1083_s0, 512 }
  0x4a   : > { %p704_p13 = scmp.lt.u32.totalorder %s969_s24, %s1083_s0  ;;  %p705_p6 = scmp.lt.u32.totalorder %s703_s5, %s698_s29 }
  0x4b   : > { %p701_p1 = pnand %p700_p0, %p699_p12  ;;  %p707_p3 = scmp.lt.u32.totalorder %s698_s29, %s969_s24 }
  0x4c   : > { %p706_p10 = por %p705_p6, %p704_p13 }
  0x4d   : > { %p702_p2 = pneg %p701_p1 }
  0x4e   : > { %p708_p7 = por %p707_p3, %p706_p10 }
  0x50   : > { %p709_p9 = pnand %p708_p7, %p702_p2 }
  0x52   : > { %712 = shalt.err (!%p709_p9)
}
  0x53   : > { %s713_s10 = scalar_lea.vmem %s971_s27, 256  ;;  %s804_s17 = smov [#allocation2]  }
  0x54   : > { %p714_p12 = scmp.ne.s32.totalorder %s971_s27, %s713_s10  ;;  %s718_s21 = sshll.u32 %s804_s17, 4  ;;  %s719_s21 = int_to_ptr.vmem [resolvable:$false] %s718_s21 }
  0x55   : > { %s720_s26 = scalar_lea.vmem %s719_s21, 512  ;;  %p721_p4 = scmp.lt.s32.totalorder %s971_s27, %s719_s21 }
  0x56   : > { %p716_p1 = pnand %p714_p12, %p700_p0  ;;  %p722_p13 = scmp.lt.s32.totalorder %s720_s26, %s713_s10 }
  0x58   : > { %p717_p5 = pneg %p716_p1  ;;  %p723_p6 = por %p722_p13, %p721_p4 }
  0x5a   : > { %p724_p10 = pnand %p723_p6, %p717_p5 }
  0x5c   : > { %727 = shalt.err (!%p724_p10)
}
  0x5d   : > { %591 = dma.hbm_to_vmem [thread:$0]  (!%p973_p11), %s969_s24, 256, %s971_s27, %s977_s22, %s802_s7, %s802_s7, %s803_s8  }
  0x5e   : > { %181 = sbr.rel (%p870_p8) target bundleno = 559 (0x22f), region = 32  ;;  %s1011_s29 = sand.u32 (!%p870_p8), 1, %s790_s13  }
  0x5f   : > { %s518_s30 = sshll.u32 (!%p870_p8), %s1011_s29, 4  ;;  %s184_s4 = scalar_lea.sflag (!%p870_p8), [#allocation3], %s1011_s29 }
  0x60   : > { %s187_s28 = scalar_lea.vmem (!%p870_p8), [#allocation2], %s518_s30  ;;  %p1097_p4 = scmp.ne.s32.totalorder (!%p870_p8), %s1090_s18, 0 }
  0x65   : > { %773 = dma.done.wait (%p1097_p4), %s184_s4, 256  }
  0x66   : > { %775 = vsyncadd (%p1097_p4), %s184_s4, 4294967040  ;;  %p1098_p5 = scmp.eq.s32.totalorder %s851_s16, 0 }
  0x68   : > { %777 = dma.done.wait (%p1098_p5), [#allocation6], 512   ;;  %p1099_p8 = pmov %p1098_p5 }
  0x69   : > { %vm228_vm0 = vcmask 130048   ;;  %v218_v0 = vld [vmem:[%s187_s28] sm:$0xff]  ;;  %v219_v1 = vld [vmem:[%s187_s28 + $0x8] sm:$0xff]  ;;  %v805_v5 = vmov 1.0|1.0   ;;  %s538_s18 = sshll.u32 %s851_s16, 8 }
  0x6a   : > { %779 = vsyncadd (%p1099_p8), [#allocation6], 4294966784  ;;  %v226_v2 = vld [vmem:[#allocation5] sm:$0xff]  ;;  %vm220_vm1 = vcmp.lt.f32.partialorder %v218_v0, 0.011111111  ;;  %v310_v3 = vld [vmem:[#allocation7] sm:$0xff]  ;;  %s1035_s27 = scalar_lea.hbm %s1086_s3, %s538_s18 }
  0x6b   : > { %vm221_vm2 = vcmp.lt.f32.partialorder %v219_v1, 0.011111111  ;;  %551 = vmatprep.mubr.msk.f32.mxu0 %vm228_vm0, %v226_v2  ;;  %v311_v4 = vld [vmem:[#allocation7 + $0x8] sm:$0xff]  ;;  %v227_v7 = vld [vmem:[#allocation5 + $0x8] sm:$0xff]  ;;  %s217_s20 = scalar_lea.vmem [#allocation8], %s518_s30  ;;  %v806_v12 = vmov 0.0  }
  0x6c   : > { %vm561_vm3 = vmpackc.low %vm221_vm2, %vm220_vm1  ;;  %v565_v6 = vpack.c.bf16 %v311_v4, %v310_v3  ;;  %s417_s7 = sshll.u32 %s217_s20, 4  ;;  %s404_s16 = scalar_lea.sflag [#allocation4], %s1011_s29  ;;  %s1037_s7 = int_to_ptr.vmem [resolvable:$true] %s417_s7 }
  0x6d   : > { %562 = vmatprep.subr.msk.bf16.mxu0 %vm561_vm3, %v805_v5  ;;  %s728_s22 = scalar_lea.vmem %s1037_s7, 256  ;;  %p1100_p0 = scmp.ne.s32.totalorder %s1095_s6, 0 }
  0x6e   : > { %564 = vmatpush3.bf16.msk.msra.mxu0 %vm561_vm3, %v805_v5  ;;  %566 = vmatprep.subr.bf16.mxu1 %v565_v6  ;;  %p729_p11 = scmp.ne.s32.totalorder %s1037_s7, %s728_s22  ;;  %s807_s5 = smov [#allocation8]  }
  0x6f   : > { %568 = vmatpush3.bf16.msra.mxu1 %v565_v6  ;;  %s732_s11 = sshll.u32 %s807_s5, 4  ;;  %s733_s11 = int_to_ptr.vmem [resolvable:$false] %s732_s11 }
  0x70   : > { %p730_p2 = pnand %p729_p11, %p1100_p0  ;;  %s734_s25 = scalar_lea.vmem %s733_s11, 512 }
  0x71   : > { %552 = vmatmul.mubr.msk.f32.vlgmr.msra.gmra.mrb[0].mxu0 %vm228_vm0, %v227_v7  ;;  %p735_p7 = scmp.lt.s32.totalorder %s1037_s7, %s733_s11  ;;  %p736_p9 = scmp.lt.s32.totalorder %s734_s25, %s728_s22 }
  0x72   : > { %p731_p3 = pneg %p730_p2 }
  0x73   : > { %p737_p12 = por %p736_p9, %p735_p7 }
  0x75   : > { %p738_p1 = pnand %p737_p12, %p731_p3 }
 0x144   : > { %v553_v8 = vpop.f32.mrb[0].mxu0 }
 0x145   : > { %v301_v9 = vpop.f32.mrb[1].mxu0 }
 0x146   : > { %558 = vmatprep.mubr.msk.f32.mxu1 %vm228_vm0, %v301_v9 }
 0x147   : > { %559 = vmatmul.mubr.msk.f32.vlgmr.msra.gmra.mrb[0].mxu1 %vm228_vm0, %v553_v8 }
 0x21a   : > { %v560_v10 = vpop.f32.mrb[0].mxu1 }
 0x21b   : > { %vm394_vm4 = vcmp.gt.f32.partialorder %v560_v10, 0.5  ;;  %v384_v11 = vpop.f32.mrb[1].mxu1 }
 0x21c   : > { %v531_v13 = vsel %vm394_vm4, 1.0, %v806_v12  ;;  %vm393_vm5 = vcmp.gt.f32.partialorder %v384_v11, 0.5 }
 0x21d   : > { %v400_v14 = vsub.f32 1.0, %v531_v13  ;;  %v530_v15 = vsel %vm393_vm5, 1.0, %v806_v12 }
 0x21e   : > { %v399_v16 = vsub.f32 1.0, %v530_v15 }
 0x21f   : > { %402 = vst.msk [vmem:[%s217_s20 + $0x8] sm:$0xff] %vm228_vm0, %v400_v14 }
 0x220   : > { %401 = vst.msk [vmem:[%s217_s20] sm:$0xff] %vm228_vm0, %v399_v16 }
 0x221   : > { %741 = shalt.err (!%p738_p1)
}
 0x222   : > { %s742_s10 = scalar_lea.hbm %s1035_s27, 256  ;;  %s746_s26 = scalar_lea.hbm %s1086_s3, 512 }
 0x223   : > { %p743_p13 = scmp.ne.s32.totalorder %s1035_s27, %s742_s10  ;;  %p747_p4 = scmp.lt.u32.totalorder %s1035_s27, %s1086_s3 }
 0x224   : > { %p748_p5 = scmp.lt.u32.totalorder %s746_s26, %s742_s10  ;;  %p750_p11 = scmp.lt.u32.totalorder %s742_s10, %s1035_s27 }
 0x225   : > { %p744_p6 = pnand %p743_p13, %p1100_p0 }
 0x226   : > { %p749_p8 = por %p748_p5, %p747_p4 }
 0x227   : > { %p745_p10 = pneg %p744_p6 }
 0x228   : > { %p751_p2 = por %p750_p11, %p749_p8 }
 0x22a   : > { %p752_p3 = pnand %p751_p2, %p745_p10 }
 0x22c   : > { %755 = shalt.err (!%p752_p3)
}
 0x22d   : > { %s808_s28 = smov 128   ;;  %s809_s18 = smov 8  }
 0x22e   : > { %579 = dma.vmem_to_hbm [thread:$0]  (%p1100_p0), %s1037_s7, 256, %s1035_s27, %s404_s16, %s808_s28, %s808_s28, %s809_s18  }
 0x22f PF: > { %s432_s20 = sand.u32 1, %s786_s12   ;;  %p1101_p7 = scmp.ne.s32.totalorder %s1091_s19, 0 }
 0x230   : > { %p1102_p9 = scmp.ge.s32.totalorder %s798_s15, 2  ;;  %s433_s8 = scalar_lea.sflag [#allocation4], %s432_s20 }
 0x232   : > { %p593_p12 = pnand %p1102_p9, %p1101_p7 }
 0x234   : > { %781 = dma.done.wait (!%p593_p12), %s433_s8, 256  }
 0x235   : > { %783 = vsyncadd (!%p593_p12), %s433_s8, 4294967040  ;;  %p17_p1 = scmp.ge.s32.totalorder %s946_s23, 4   ;;  %s1103_s12 = smov %s790_s13 }
 0x236   : > { %s1104_s13 = smov %s794_s14  ;;  %s1105_s14 = smov %s962_s9 }
 0x237   : > { %s1106_s15 = smov %s946_s23  ;;  %19 = sbr.rel (!%p17_p1) target bundleno = 6 (0x6), region = 85 }
 0x23e   :  { %438 = vsyncpa [#allocation3], 1 }
 0x23f   :  { %440 = vsyncpa [#allocation3 + $0x1], 1 }
 0x240   :  { %441 = vsyncpa [#allocation6], 1 }
 0x241   :  { %442 = vsyncpa [#allocation4], 1 }
 0x242   :  { %444 = vsyncpa [#allocation4 + $0x1], 1 }

</bundles_post_ra>
